<compile_context>
chip_gen: v7x
topology: tpu7x:2x2x1
jax: 0.10.0
libtpu: 0.0.40
codegen_flags: <defaults>
</compile_context>

<pallas_src>
import functools

import jax
import jax.numpy as jnp
from jax.experimental import pallas as pl
from jax.experimental.pallas import tpu as pltpu

EPS = 1e-5
F32 = jnp.float32
BF16 = jnp.bfloat16


def _round_up(x, m):
    return (x + m - 1) // m * m


def _vmem_capacity_bytes():
    try:
        return int(pltpu.get_tpu_info().vmem_capacity_bytes)
    except Exception:
        return 64 * 1024 * 1024  # conservative (v7x per-TC budget)


# ---------------------------------------------------------------------------
# Kernel 1: batch statistics + pre-BN Linear2 output (grid = (2, row tiles)).
# ---------------------------------------------------------------------------
def _make_stats_kernel(n_real, pad_count):
    """n_real / pad_count are static Python ints."""
    inv_n = 1.0 / float(n_real)

    def kernel(h_ref, w1_ref, g1_ref, be1_ref, w2_ref, gbn_ref, bbn_ref,
               y_ref, s2_ref, acc1_ref, acc2_ref):
        phase = pl.program_id(0)
        tile = pl.program_id(1)
        last_tile = pl.num_programs(1) - 1

        def linear1():
            # bf16 MXU operands, f32 accumulation.  No bias: training-mode BN
            # subtracts the batch mean, so the Linear biases cancel exactly.
            return jnp.dot(h_ref[...], w1_ref[...],
                           preferred_element_type=F32)

        # ---- first step: zero the accumulators -----------------------------
        @pl.when(jnp.logical_and(phase == 0, tile == 0))
        def _():
            acc1_ref[...] = jnp.zeros_like(acc1_ref)
            acc2_ref[...] = jnp.zeros_like(acc2_ref)

        # ---- phase 0: Linear1 sum / sum-of-squares --------------------------
        # (zero-padded rows contribute exactly 0 -> no masking needed)
        @pl.when(phase == 0)
        def _():
            x1 = linear1()
            acc1_ref[0:1, :] += jnp.sum(x1, axis=0, keepdims=True)
            acc1_ref[1:2, :] += jnp.sum(x1 * x1, axis=0, keepdims=True)

        # ---- phase 1, first tile: fold BN1 -> [scale1; shift1] in place -----
        @pl.when(jnp.logical_and(phase == 1, tile == 0))
        def _():
            s = acc1_ref[0:1, :]
            ss = acc1_ref[1:2, :]
            mu = s * inv_n
            var = jnp.maximum(ss * inv_n - mu * mu, 0.0)
            scale = g1_ref[...] * jax.lax.rsqrt(var + EPS)
            acc1_ref[0:1, :] = scale
            acc1_ref[1:2, :] = be1_ref[...] - mu * scale

        # ---- phase 1: hidden + Linear2, stash pre-BN y, accumulate stats ----
        @pl.when(phase == 1)
        def _():
            x1 = linear1()
            hdn = jnp.maximum(x1 * acc1_ref[0:1, :] + acc1_ref[1:2, :], 0.0)
            y = jnp.dot(hdn.astype(BF16), w2_ref[...],
                        preferred_element_type=F32)
            y_ref[...] = y
            acc2_ref[0:1, :] += jnp.sum(y, axis=0, keepdims=True)
            acc2_ref[1:2, :] += jnp.sum(y * y, axis=0, keepdims=True)

        # ---- phase 1, last tile: padded-row correction + fold BN2 -----------
        @pl.when(jnp.logical_and(phase == 1, tile == last_tile))
        def _():
            s = acc2_ref[0:1, :]
            ss = acc2_ref[1:2, :]
            if pad_count > 0:
                # Every zero-padded row produces the same constant row
                # c = relu(shift1) @ W2 (bf16 path identical to the main one).
                c = jnp.dot(jnp.maximum(acc1_ref[1:2, :], 0.0).astype(BF16),
                            w2_ref[...], preferred_element_type=F32)
                s = s - float(pad_count) * c
                ss = ss - float(pad_count) * (c * c)
            mu = s * inv_n
            var = jnp.maximum(ss * inv_n - mu * mu, 0.0)
            scale = gbn_ref[...] * jax.lax.rsqrt(var + EPS)
            s2_ref[0:1, :] = scale
            s2_ref[1:2, :] = bbn_ref[...] - mu * scale

    return kernel


# ---------------------------------------------------------------------------
# Kernel 2: elementwise finalize (folded BN2 + sigmoid), in place over y.
# ---------------------------------------------------------------------------
def _finalize_kernel(y_ref, s2_ref, out_ref):
    out_ref[...] = jax.nn.sigmoid(
        y_ref[...] * s2_ref[0:1, :] + s2_ref[1:2, :]).astype(out_ref.dtype)


# ---------------------------------------------------------------------------
# Pipeline builder (cached per static shape configuration).
# ---------------------------------------------------------------------------
@functools.lru_cache(maxsize=None)
def _build_pipeline(n, n_pad, tn, in_p, hid_p, out_p, vmem_limit):
    num_tiles = n_pad // tn
    pad_count = n_pad - n
    stats_kernel = _make_stats_kernel(n, pad_count)

    const = lambda p, t: (0, 0)
    res = dict(pipeline_mode=pl.Buffered(1))  # resident, never re-fetched

    stats_call = pl.pallas_call(
        stats_kernel,
        out_shape=(jax.ShapeDtypeStruct((n_pad, out_p), F32),  # pre-BN Linear2
                   jax.ShapeDtypeStruct((2, out_p), F32)),     # [scale2; shift2]
        grid_spec=pltpu.PrefetchScalarGridSpec(
            num_scalar_prefetch=0,
            grid=(2, num_tiles),                               # (phase, row tile)
            in_specs=[
                pl.BlockSpec((tn, in_p), lambda p, t: (t, 0)),     # h (row tiled)
                pl.BlockSpec((in_p, hid_p), const, **res),         # w1
                pl.BlockSpec((1, hid_p), const, **res),            # gamma1
                pl.BlockSpec((1, hid_p), const, **res),            # beta1
                pl.BlockSpec((hid_p, out_p), const, **res),        # w2
                pl.BlockSpec((1, out_p), const, **res),            # gamma_out
                pl.BlockSpec((1, out_p), const, **res),            # beta_out
            ],
            out_specs=[
                # y block index only advances in phase 1 -> each tile is
                # written to HBM exactly once, with real data (no revisit).
                pl.BlockSpec((tn, out_p), lambda p, t: (t * p, 0)),
                pl.BlockSpec((2, out_p), const),
            ],
            scratch_shapes=[
                pltpu.VMEM((2, hid_p), F32),  # BN1 [sum; sumsq] -> [scale; shift]
                pltpu.VMEM((2, out_p), F32),  # BN2 [sum; sumsq]
            ]),
        compiler_params=pltpu.CompilerParams(
            # Both axes carry accumulator state -> sequential.
            dimension_semantics=("arbitrary", "arbitrary"),
            vmem_limit_bytes=vmem_limit),
    )

    finalize_call = pl.pallas_call(
        _finalize_kernel,
        out_shape=jax.ShapeDtypeStruct((n_pad, out_p), F32),
        grid_spec=pltpu.PrefetchScalarGridSpec(
            num_scalar_prefetch=0,
            grid=(num_tiles,),
            in_specs=[
                pl.BlockSpec((tn, out_p), lambda t: (t, 0)),       # y (aliased)
                pl.BlockSpec((2, out_p), lambda t: (0, 0), **res),  # scale/shift
            ],
            out_specs=pl.BlockSpec((tn, out_p), lambda t: (t, 0))),
        compiler_params=pltpu.CompilerParams(
            dimension_semantics=("parallel",),   # elementwise -> megacore OK
            vmem_limit_bytes=vmem_limit),
        input_output_aliases={0: 0},             # finalize y in place
    )

    def pipeline(h_p, w1, g1, be1, w2, gbn, bbn):
        y_buf, s2 = stats_call(h_p, w1, g1, be1, w2, gbn, bbn)
        return finalize_call(y_buf, s2)

    return jax.jit(pipeline)


# ---------------------------------------------------------------------------
# Parameter preparation (done once, hoisted out of the per-call path).
# ---------------------------------------------------------------------------
def prepare_params(params):
    """Zero-pad feature dims to multiples of 128 and cast MXU weights to bf16.

    b1 / b2 are intentionally dropped: training-mode BatchNorm removes the
    batch mean, so the Linear biases cancel exactly in the forward output.
    """
    in_dim, hid_dim = params["w1"].shape
    out_dim = params["w2"].shape[1]
    in_p = _round_up(in_dim, 128)
    hid_p = _round_up(hid_dim, 128)
    out_p = _round_up(out_dim, 128)

    w1 = jnp.zeros((in_p, hid_p), BF16).at[:in_dim, :hid_dim].set(
        params["w1"].astype(BF16))
    w2 = jnp.zeros((hid_p, out_p), BF16).at[:hid_dim, :out_dim].set(
        params["w2"].astype(BF16))

    def pad_vec(v, width):
        v = v.reshape(1, -1).astype(F32)
        return jnp.zeros((1, width), F32).at[:, :v.shape[1]].set(v)

    return dict(
        w1=w1, w2=w2,
        g1=pad_vec(params["g1"], hid_p), be1=pad_vec(params["be1"], hid_p),
        gbn=pad_vec(params["gbn"], out_p), bbn=pad_vec(params["bbn"], out_p),
        dims=(in_dim, hid_dim, out_dim),
    )


def apply_node_func(h, prepared, *, row_tile=None):
    """h: (N, in_dim) float32.  Returns (N, out_dim) float32."""
    in_dim, _, out_dim = prepared["dims"]
    n = h.shape[0]
    assert h.shape[1] == in_dim
    in_p, hid_p = prepared["w1"].shape
    out_p = prepared["w2"].shape[1]

    # Generation-aware tuning: 3/4 of physical VMEM, bigger tiles on 128-MiB
    # parts (v5e/v6e), smaller on 64-MiB parts (v7x).
    vmem_cap = _vmem_capacity_bytes()
    vmem_limit = int(vmem_cap * 3 // 4)
    if row_tile is None:
        row_tile = 512 if vmem_cap >= (96 << 20) else 256

    row_tile = max(16, _round_up(row_tile, 16))
    tn = min(row_tile, _round_up(n, 16))
    n_pad = _round_up(n, tn)

    # Per-call node-feature prep: a single cast pass, zero-pad only if needed.
    if n_pad == n and in_p == in_dim:
        h_p = h.astype(BF16)
    else:
        h_p = jnp.zeros((n_pad, in_p), BF16).at[:n, :in_dim].set(h.astype(BF16))

    fn = _build_pipeline(n, n_pad, tn, in_p, hid_p, out_p, vmem_limit)
    out_padded = fn(h_p, prepared["w1"], prepared["g1"], prepared["be1"],
                    prepared["w2"], prepared["gbn"], prepared["bbn"])
    return out_padded[:n, :out_dim]


# ---------------------------------------------------------------------------
# Pure-JAX reference (matches PyTorch training-mode forward, with biases).
# ---------------------------------------------------------------------------
def apply_node_func_reference(h, params):
    x = h @ params["w1"] + params["b1"]
    mu = jnp.mean(x, axis=0, keepdims=True)
    var = jnp.mean((x - mu) ** 2, axis=0, keepdims=True)
    x = (x - mu) * jax.lax.rsqrt(var + EPS) * params["g1"] + params["be1"]
    x = jnp.maximum(x, 0.0)
    y = x @ params["w2"] + params["b2"]
    mu2 = jnp.mean(y, axis=0, keepdims=True)
    var2 = jnp.mean((y - mu2) ** 2, axis=0, keepdims=True)
    y = (y - mu2) * jax.lax.rsqrt(var2 + EPS) * params["gbn"] + params["bbn"]
    return jax.nn.sigmoid(y)


def init_params(key, in_dim, hid_dim, out_dim):
    """Deterministic synthetic init (PyTorch-shaped, weights pre-transposed)."""
    k1, k2, k3, k4 = jax.random.split(key, 4)
    w1 = jax.random.normal(k1, (in_dim, hid_dim), jnp.float32) * 0.1
    b1 = jax.random.normal(k2, (1, hid_dim), jnp.float32) * 0.1
    w2 = jax.random.normal(k3, (hid_dim, out_dim), jnp.float32) * 0.1
    b2 = jax.random.normal(k4, (1, out_dim), jnp.float32) * 0.1
    g1 = jnp.ones((1, hid_dim), jnp.float32)
    be1 = jnp.zeros((1, hid_dim), jnp.float32)
    gbn = jnp.ones((1, out_dim), jnp.float32)
    bbn = jnp.zeros((1, out_dim), jnp.float32)
    return dict(w1=w1, b1=b1, g1=g1, be1=be1, w2=w2, b2=b2, gbn=gbn, bbn=bbn)


if __name__ == "__main__":
    key = jax.random.PRNGKey(0)
    k_h, k_p, k_h2, k_p2 = jax.random.split(key, 4)

    # Small demo shape (single row tile, padded rows + lanes).
    N, IN_DIM, HID_DIM, OUT_DIM = 8, 32, 32, 32
    h = jax.random.normal(k_h, (N, IN_DIM), jnp.float32)
    params = init_params(k_p, IN_DIM, HID_DIM, OUT_DIM)
    prepared = prepare_params(params)

    out = apply_node_func(h, prepared)
    jax.block_until_ready(out)
    ref = apply_node_func_reference(h, params)
    assert out.shape == (N, OUT_DIM)
    assert bool(jnp.all(jnp.isfinite(out)))
    assert bool(jnp.all((out >= 0.0) & (out <= 1.0)))
    err = float(jnp.max(jnp.abs(out - ref)))
    assert err < 5e-2, err

    # Multi-tile path: N not a multiple of the row tile (exercises the
    # analytic padded-row correction, cross-tile stat accumulation, the
    # 2-phase grid and the parallel elementwise finalize).
    N2, IN2, HID2, OUT2 = 300, 32, 64, 32
    h2 = jax.random.normal(k_h2, (N2, IN2), jnp.float32)
    params2 = init_params(k_p2, IN2, HID2, OUT2)
    out2 = apply_node_func(h2, prepare_params(params2), row_tile=128)
    jax.block_until_ready(out2)
    ref2 = apply_node_func_reference(h2, params2)
    assert out2.shape == (N2, OUT2)
    err2 = float(jnp.max(jnp.abs(out2 - ref2)))
    assert err2 < 5e-2, err2

    print("KERNEL_OK")
</pallas_src>

<mosaic_0001>
module attributes {stable_mosaic.version = 11 : i64} {
  func.func @_finalize_kernel(%arg0: i32, %arg1: memref<16x128xf32, #tpu.memory_space<vmem>>, %arg2: memref<2x128xf32, #tpu.memory_space<vmem>>, %arg3: memref<16x128xf32, #tpu.memory_space<vmem>>) attributes {dimension_semantics = [#tpu.dimension_semantics<parallel>], iteration_bounds = array<i64: 1>, scalar_prefetch = 0 : i64, scratch_operands = 0 : i64, tpu.core_type = #tpu.core_type<tc>, window_params = [{transform_indices = @transform_0, window_bounds = array<i64: 16, 128>}, {pipeline_mode = #tpu.pipeline_mode<synchronous>, transform_indices = @transform_1, window_bounds = array<i64: 2, 128>}, {transform_indices = @transform_2, window_bounds = array<i64: 16, 128>}]} {
    %c0 = arith.constant 0 : index
    %c0_0 = arith.constant 0 : index
    %0 = vector.load %arg1[%c0, %c0_0] : memref<16x128xf32, #tpu.memory_space<vmem>>, vector<16x128xf32>
    %c0_1 = arith.constant 0 : index
    %c0_2 = arith.constant 0 : index
    %1 = vector.load %arg2[%c0_1, %c0_2] : memref<2x128xf32, #tpu.memory_space<vmem>>, vector<1x128xf32>
    %2 = vector.broadcast %1 : vector<1x128xf32> to vector<16x128xf32>
    %3 = arith.mulf %0, %2 : vector<16x128xf32>
    %c1 = arith.constant 1 : index
    %c0_3 = arith.constant 0 : index
    %4 = vector.load %arg2[%c1, %c0_3] : memref<2x128xf32, #tpu.memory_space<vmem>>, vector<1x128xf32>
    %5 = vector.broadcast %4 : vector<1x128xf32> to vector<16x128xf32>
    %6 = arith.addf %3, %5 : vector<16x128xf32>
    %7 = arith.negf %6 : vector<16x128xf32>
    %8 = math.exp %7 : vector<16x128xf32>
    %cst = arith.constant 1.000000e+00 : f32
    %9 = vector.broadcast %cst : f32 to vector<16x128xf32>
    %10 = arith.addf %9, %8 : vector<16x128xf32>
    %11 = arith.divf %9, %10 : vector<16x128xf32>
    %c0_4 = arith.constant 0 : index
    %c0_5 = arith.constant 0 : index
    %12 = vector.load %arg3[%c0_4, %c0_5] : memref<16x128xf32, #tpu.memory_space<vmem>>, vector<16x128xf32>
    tpu.vector_store %arg3[%c0_4, %c0_5], %11 {strides = array<i32>} : memref<16x128xf32, #tpu.memory_space<vmem>>, vector<16x128xf32>,
    return
  }
  func.func @transform_0(%arg0: i32) -> (i32, i32) {
    %c0_i32 = arith.constant 0 : i32
    %c0_i32_0 = arith.constant 0 : i32
    return %arg0, %c0_i32 : i32, i32
  }
  func.func @transform_1(%arg0: i32) -> (i32, i32) {
    %c0_i32 = arith.constant 0 : i32
    %c0_i32_0 = arith.constant 0 : i32
    %c0_i32_1 = arith.constant 0 : i32
    return %c0_i32, %c0_i32_0 : i32, i32
  }
  func.func @transform_2(%arg0: i32) -> (i32, i32) {
    %c0_i32 = arith.constant 0 : i32
    %c0_i32_0 = arith.constant 0 : i32
    return %arg0, %c0_i32 : i32, i32
  }
}

module attributes {stable_mosaic.version = 11 : i64} {
  func.func @kernel(%arg0: i32, %arg1: i32, %arg2: memref<16x128xbf16, #tpu.memory_space<vmem>>, %arg3: memref<128x128xbf16, #tpu.memory_space<vmem>>, %arg4: memref<1x128xf32, #tpu.memory_space<vmem>>, %arg5: memref<1x128xf32, #tpu.memory_space<vmem>>, %arg6: memref<128x128xbf16, #tpu.memory_space<vmem>>, %arg7: memref<1x128xf32, #tpu.memory_space<vmem>>, %arg8: memref<1x128xf32, #tpu.memory_space<vmem>>, %arg9: memref<16x128xf32, #tpu.memory_space<vmem>>, %arg10: memref<2x128xf32, #tpu.memory_space<vmem>>, %arg11: memref<2x128xf32, #tpu.memory_space<vmem>>, %arg12: memref<2x128xf32, #tpu.memory_space<vmem>>) attributes {dimension_semantics = [#tpu.dimension_semantics<arbitrary>, #tpu.dimension_semantics<arbitrary>], iteration_bounds = array<i64: 2, 1>, scalar_prefetch = 0 : i64, scratch_operands = 2 : i64, tpu.core_type = #tpu.core_type<tc>, window_params = [{transform_indices = @transform_0, window_bounds = array<i64: 16, 128>}, {pipeline_mode = #tpu.pipeline_mode<synchronous>, transform_indices = @transform_1, window_bounds = array<i64: 128, 128>}, {pipeline_mode = #tpu.pipeline_mode<synchronous>, transform_indices = @transform_2, window_bounds = array<i64: 1, 128>}, {pipeline_mode = #tpu.pipeline_mode<synchronous>, transform_indices = @transform_3, window_bounds = array<i64: 1, 128>}, {pipeline_mode = #tpu.pipeline_mode<synchronous>, transform_indices = @transform_4, window_bounds = array<i64: 128, 128>}, {pipeline_mode = #tpu.pipeline_mode<synchronous>, transform_indices = @transform_5, window_bounds = array<i64: 1, 128>}, {pipeline_mode = #tpu.pipeline_mode<synchronous>, transform_indices = @transform_6, window_bounds = array<i64: 1, 128>}, {transform_indices = @transform_7, window_bounds = array<i64: 16, 128>}, {pipeline_mode = #tpu.pipeline_mode<synchronous>, transform_indices = @transform_8, window_bounds = array<i64: 2, 128>}]} {
    %c0_i32 = arith.constant 0 : i32
    %0 = arith.cmpi eq, %arg0, %c0_i32 : i32
    %c0_i32_0 = arith.constant 0 : i32
    %1 = arith.cmpi eq, %arg1, %c0_i32_0 : i32
    %2 = arith.andi %0, %1 : i1
    %3 = arith.extui %2 : i1 to i32
    %c0_i32_1 = arith.constant 0 : i32
    %4 = arith.cmpi ne, %3, %c0_i32_1 : i32
    scf.if %4 {
      %cst = arith.constant 0.000000e+00 : f32
      %21 = vector.broadcast %cst : f32 to vector<2x128xf32>
      %c0 = arith.constant 0 : index
      %c0_11 = arith.constant 0 : index
      %22 = vector.load %arg11[%c0, %c0_11] : memref<2x128xf32, #tpu.memory_space<vmem>>, vector<2x128xf32>
      tpu.vector_store %arg11[%c0, %c0_11], %21 {strides = array<i32>} : memref<2x128xf32, #tpu.memory_space<vmem>>, vector<2x128xf32>,
      %cst_12 = arith.constant 0.000000e+00 : f32
      %23 = vector.broadcast %cst_12 : f32 to vector<2x128xf32>
      %c0_13 = arith.constant 0 : index
      %c0_14 = arith.constant 0 : index
      %24 = vector.load %arg12[%c0_13, %c0_14] : memref<2x128xf32, #tpu.memory_space<vmem>>, vector<2x128xf32>
      tpu.vector_store %arg12[%c0_13, %c0_14], %23 {strides = array<i32>} : memref<2x128xf32, #tpu.memory_space<vmem>>, vector<2x128xf32>,
    } else {
    }
    %c0_i32_2 = arith.constant 0 : i32
    %5 = arith.cmpi eq, %arg0, %c0_i32_2 : i32
    %6 = arith.extui %5 : i1 to i32
    %c0_i32_3 = arith.constant 0 : i32
    %7 = arith.cmpi ne, %6, %c0_i32_3 : i32
    scf.if %7 {
      %c0 = arith.constant 0 : index
      %c0_11 = arith.constant 0 : index
      %21 = vector.load %arg2[%c0, %c0_11] : memref<16x128xbf16, #tpu.memory_space<vmem>>, vector<16x128xbf16>
      %c0_12 = arith.constant 0 : index
      %c0_13 = arith.constant 0 : index
      %22 = vector.load %arg3[%c0_12, %c0_13] : memref<128x128xbf16, #tpu.memory_space<vmem>>, vector<128x128xbf16>
      %cst = arith.constant dense<0.000000e+00> : vector<16x128xf32>
      %23 = tpu.matmul %21, %22, %cst {dimension_numbers = #tpu.dot_dimension_numbers<[1], [0], [0], [1], [0, 0, 1, 1], [], []>} : vector<16x128xbf16>, vector<128x128xbf16>, vector<16x128xf32> -> vector<16x128xf32>
      %c0_14 = arith.constant 0 : index
      %c0_15 = arith.constant 0 : index
      %24 = vector.load %arg11[%c0_14, %c0_15] : memref<2x128xf32, #tpu.memory_space<vmem>>, vector<1x128xf32>
      %cst_16 = arith.constant dense<0.000000e+00> : vector<128xf32>
      %25 = vector.multi_reduction <add>, %23, %cst_16 [0] : vector<16x128xf32> to vector<128xf32>
      %26 = vector.shape_cast %25 : vector<128xf32> to vector<1x128xf32>
      %27 = arith.addf %24, %26 : vector<1x128xf32>
      %c0_17 = arith.constant 0 : index
      %c0_18 = arith.constant 0 : index
      %28 = vector.load %arg11[%c0_17, %c0_18] : memref<2x128xf32, #tpu.memory_space<vmem>>, vector<1x128xf32>
      tpu.vector_store %arg11[%c0_17, %c0_18], %27 {strides = array<i32>} : memref<2x128xf32, #tpu.memory_space<vmem>>, vector<1x128xf32>,
      %c1 = arith.constant 1 : index
      %c0_19 = arith.constant 0 : index
      %29 = vector.load %arg11[%c1, %c0_19] : memref<2x128xf32, #tpu.memory_space<vmem>>, vector<1x128xf32>
      %30 = arith.mulf %23, %23 : vector<16x128xf32>
      %cst_20 = arith.constant dense<0.000000e+00> : vector<128xf32>
      %31 = vector.multi_reduction <add>, %30, %cst_20 [0] : vector<16x128xf32> to vector<128xf32>
      %32 = vector.shape_cast %31 : vector<128xf32> to vector<1x128xf32>
      %33 = arith.addf %29, %32 : vector<1x128xf32>
      %c1_21 = arith.constant 1 : index
      %c0_22 = arith.constant 0 : index
      %34 = vector.load %arg11[%c1_21, %c0_22] : memref<2x128xf32, #tpu.memory_space<vmem>>, vector<1x128xf32>
      tpu.vector_store %arg11[%c1_21, %c0_22], %33 {strides = array<i32>} : memref<2x128xf32, #tpu.memory_space<vmem>>, vector<1x128xf32>,
    } else {
    }
    %c1_i32 = arith.constant 1 : i32
    %8 = arith.cmpi eq, %arg0, %c1_i32 : i32
    %c0_i32_4 = arith.constant 0 : i32
    %9 = arith.cmpi eq, %arg1, %c0_i32_4 : i32
    %10 = arith.andi %8, %9 : i1
    %11 = arith.extui %10 : i1 to i32
    %c0_i32_5 = arith.constant 0 : i32
    %12 = arith.cmpi ne, %11, %c0_i32_5 : i32
    scf.if %12 {
      %c0 = arith.constant 0 : index
      %c0_11 = arith.constant 0 : index
      %21 = vector.load %arg11[%c0, %c0_11] : memref<2x128xf32, #tpu.memory_space<vmem>>, vector<1x128xf32>
      %c1 = arith.constant 1 : index
      %c0_12 = arith.constant 0 : index
      %22 = vector.load %arg11[%c1, %c0_12] : memref<2x128xf32, #tpu.memory_space<vmem>>, vector<1x128xf32>
      %cst = arith.constant 1.250000e-01 : f32
      %23 = vector.broadcast %cst : f32 to vector<1x128xf32>
      %24 = arith.mulf %21, %23 : vector<1x128xf32>
      %cst_13 = arith.constant 1.250000e-01 : f32
      %25 = vector.broadcast %cst_13 : f32 to vector<1x128xf32>
      %26 = arith.mulf %22, %25 : vector<1x128xf32>
      %27 = arith.mulf %24, %24 : vector<1x128xf32>
      %28 = arith.subf %26, %27 : vector<1x128xf32>
      %cst_14 = arith.constant 0.000000e+00 : f32
      %29 = vector.broadcast %cst_14 : f32 to vector<1x128xf32>
      %30 = arith.maximumf %28, %29 : vector<1x128xf32>
      %c0_15 = arith.constant 0 : index
      %c0_16 = arith.constant 0 : index
      %31 = vector.load %arg4[%c0_15, %c0_16] : memref<1x128xf32, #tpu.memory_space<vmem>>, vector<1x128xf32>
      %cst_17 = arith.constant 9.99999974E-6 : f32
      %32 = vector.broadcast %cst_17 : f32 to vector<1x128xf32>
      %33 = arith.addf %30, %32 : vector<1x128xf32>
      %34 = math.rsqrt %33 : vector<1x128xf32>
      %35 = arith.mulf %31, %34 : vector<1x128xf32>
      %c0_18 = arith.constant 0 : index
      %c0_19 = arith.constant 0 : index
      %36 = vector.load %arg11[%c0_18, %c0_19] : memref<2x128xf32, #tpu.memory_space<vmem>>, vector<1x128xf32>
      tpu.vector_store %arg11[%c0_18, %c0_19], %35 {strides = array<i32>} : memref<2x128xf32, #tpu.memory_space<vmem>>, vector<1x128xf32>,
      %c0_20 = arith.constant 0 : index
      %c0_21 = arith.constant 0 : index
      %37 = vector.load %arg5[%c0_20, %c0_21] : memref<1x128xf32, #tpu.memory_space<vmem>>, vector<1x128xf32>
      %38 = arith.mulf %24, %35 : vector<1x128xf32>
      %39 = arith.subf %37, %38 : vector<1x128xf32>
      %c1_22 = arith.constant 1 : index
      %c0_23 = arith.constant 0 : index
      %40 = vector.load %arg11[%c1_22, %c0_23] : memref<2x128xf32, #tpu.memory_space<vmem>>, vector<1x128xf32>
      tpu.vector_store %arg11[%c1_22, %c0_23], %39 {strides = array<i32>} : memref<2x128xf32, #tpu.memory_space<vmem>>, vector<1x128xf32>,
    } else {
    }
    %c1_i32_6 = arith.constant 1 : i32
    %13 = arith.cmpi eq, %arg0, %c1_i32_6 : i32
    %14 = arith.extui %13 : i1 to i32
    %c0_i32_7 = arith.constant 0 : i32
    %15 = arith.cmpi ne, %14, %c0_i32_7 : i32
    scf.if %15 {
      %c0 = arith.constant 0 : index
      %c0_11 = arith.constant 0 : index
      %21 = vector.load %arg2[%c0, %c0_11] : memref<16x128xbf16, #tpu.memory_space<vmem>>, vector<16x128xbf16>
      %c0_12 = arith.constant 0 : index
      %c0_13 = arith.constant 0 : index
      %22 = vector.load %arg3[%c0_12, %c0_13] : memref<128x128xbf16, #tpu.memory_space<vmem>>, vector<128x128xbf16>
      %cst = arith.constant dense<0.000000e+00> : vector<16x128xf32>
      %23 = tpu.matmul %21, %22, %cst {dimension_numbers = #tpu.dot_dimension_numbers<[1], [0], [0], [1], [0, 0, 1, 1], [], []>} : vector<16x128xbf16>, vector<128x128xbf16>, vector<16x128xf32> -> vector<16x128xf32>
      %c0_14 = arith.constant 0 : index
      %c0_15 = arith.constant 0 : index
      %24 = vector.load %arg11[%c0_14, %c0_15] : memref<2x128xf32, #tpu.memory_space<vmem>>, vector<1x128xf32>
      %25 = vector.broadcast %24 : vector<1x128xf32> to vector<16x128xf32>
      %26 = arith.mulf %23, %25 : vector<16x128xf32>
      %c1 = arith.constant 1 : index
      %c0_16 = arith.constant 0 : index
      %27 = vector.load %arg11[%c1, %c0_16] : memref<2x128xf32, #tpu.memory_space<vmem>>, vector<1x128xf32>
      %28 = vector.broadcast %27 : vector<1x128xf32> to vector<16x128xf32>
      %29 = arith.addf %26, %28 : vector<16x128xf32>
      %cst_17 = arith.constant 0.000000e+00 : f32
      %30 = vector.broadcast %cst_17 : f32 to vector<16x128xf32>
      %31 = arith.maximumf %29, %30 : vector<16x128xf32>
      %32 = arith.truncf %31 : vector<16x128xf32> to vector<16x128xbf16>
      %c0_18 = arith.constant 0 : index
      %c0_19 = arith.constant 0 : index
      %33 = vector.load %arg6[%c0_18, %c0_19] : memref<128x128xbf16, #tpu.memory_space<vmem>>, vector<128x128xbf16>
      %cst_20 = arith.constant dense<0.000000e+00> : vector<16x128xf32>
      %34 = tpu.matmul %32, %33, %cst_20 {dimension_numbers = #tpu.dot_dimension_numbers<[1], [0], [0], [1], [0, 0, 1, 1], [], []>} : vector<16x128xbf16>, vector<128x128xbf16>, vector<16x128xf32> -> vector<16x128xf32>
      %c0_21 = arith.constant 0 : index
      %c0_22 = arith.constant 0 : index
      %35 = vector.load %arg9[%c0_21, %c0_22] : memref<16x128xf32, #tpu.memory_space<vmem>>, vector<16x128xf32>
      tpu.vector_store %arg9[%c0_21, %c0_22], %34 {strides = array<i32>} : memref<16x128xf32, #tpu.memory_space<vmem>>, vector<16x128xf32>,
      %c0_23 = arith.constant 0 : index
      %c0_24 = arith.constant 0 : index
      %36 = vector.load %arg12[%c0_23, %c0_24] : memref<2x128xf32, #tpu.memory_space<vmem>>, vector<1x128xf32>
      %cst_25 = arith.constant dense<0.000000e+00> : vector<128xf32>
      %37 = vector.multi_reduction <add>, %34, %cst_25 [0] : vector<16x128xf32> to vector<128xf32>
      %38 = vector.shape_cast %37 : vector<128xf32> to vector<1x128xf32>
      %39 = arith.addf %36, %38 : vector<1x128xf32>
      %c0_26 = arith.constant 0 : index
      %c0_27 = arith.constant 0 : index
      %40 = vector.load %arg12[%c0_26, %c0_27] : memref<2x128xf32, #tpu.memory_space<vmem>>, vector<1x128xf32>
      tpu.vector_store %arg12[%c0_26, %c0_27], %39 {strides = array<i32>} : memref<2x128xf32, #tpu.memory_space<vmem>>, vector<1x128xf32>,
      %c1_28 = arith.constant 1 : index
      %c0_29 = arith.constant 0 : index
      %41 = vector.load %arg12[%c1_28, %c0_29] : memref<2x128xf32, #tpu.memory_space<vmem>>, vector<1x128xf32>
      %42 = arith.mulf %34, %34 : vector<16x128xf32>
      %cst_30 = arith.constant dense<0.000000e+00> : vector<128xf32>
      %43 = vector.multi_reduction <add>, %42, %cst_30 [0] : vector<16x128xf32> to vector<128xf32>
      %44 = vector.shape_cast %43 : vector<128xf32> to vector<1x128xf32>
      %45 = arith.addf %41, %44 : vector<1x128xf32>
      %c1_31 = arith.constant 1 : index
      %c0_32 = arith.constant 0 : index
      %46 = vector.load %arg12[%c1_31, %c0_32] : memref<2x128xf32, #tpu.memory_space<vmem>>, vector<1x128xf32>
      tpu.vector_store %arg12[%c1_31, %c0_32], %45 {strides = array<i32>} : memref<2x128xf32, #tpu.memory_space<vmem>>, vector<1x128xf32>,
    } else {
    }
    %c1_i32_8 = arith.constant 1 : i32
    %16 = arith.cmpi eq, %arg0, %c1_i32_8 : i32
    %c0_i32_9 = arith.constant 0 : i32
    %17 = arith.cmpi eq, %arg1, %c0_i32_9 : i32
    %18 = arith.andi %16, %17 : i1
    %19 = arith.extui %18 : i1 to i32
    %c0_i32_10 = arith.constant 0 : i32
    %20 = arith.cmpi ne, %19, %c0_i32_10 : i32
    scf.if %20 {
      %c0 = arith.constant 0 : index
      %c0_11 = arith.constant 0 : index
      %21 = vector.load %arg12[%c0, %c0_11] : memref<2x128xf32, #tpu.memory_space<vmem>>, vector<1x128xf32>
      %c1 = arith.constant 1 : index
      %c0_12 = arith.constant 0 : index
      %22 = vector.load %arg12[%c1, %c0_12] : memref<2x128xf32, #tpu.memory_space<vmem>>, vector<1x128xf32>
      %c1_13 = arith.constant 1 : index
      %c0_14 = arith.constant 0 : index
      %23 = vector.load %arg11[%c1_13, %c0_14] : memref<2x128xf32, #tpu.memory_space<vmem>>, vector<1x128xf32>
      %cst = arith.constant 0.000000e+00 : f32
      %24 = vector.broadcast %cst : f32 to vector<1x128xf32>
      %25 = arith.maximumf %23, %24 : vector<1x128xf32>
      %26 = arith.truncf %25 : vector<1x128xf32> to vector<1x128xbf16>
      %c0_15 = arith.constant 0 : index
      %c0_16 = arith.constant 0 : index
      %27 = vector.load %arg6[%c0_15, %c0_16] : memref<128x128xbf16, #tpu.memory_space<vmem>>, vector<128x128xbf16>
      %cst_17 = arith.constant dense<0.000000e+00> : vector<1x128xf32>
      %28 = tpu.matmul %26, %27, %cst_17 {dimension_numbers = #tpu.dot_dimension_numbers<[1], [0], [0], [1], [0, 0, 1, 1], [], []>} : vector<1x128xbf16>, vector<128x128xbf16>, vector<1x128xf32> -> vector<1x128xf32>
      %cst_18 = arith.constant 8.000000e+00 : f32
      %29 = vector.broadcast %cst_18 : f32 to vector<1x128xf32>
      %30 = arith.mulf %29, %28 : vector<1x128xf32>
      %31 = arith.subf %21, %30 : vector<1x128xf32>
      %32 = arith.mulf %28, %28 : vector<1x128xf32>
      %cst_19 = arith.constant 8.000000e+00 : f32
      %33 = vector.broadcast %cst_19 : f32 to vector<1x128xf32>
      %34 = arith.mulf %33, %32 : vector<1x128xf32>
      %35 = arith.subf %22, %34 : vector<1x128xf32>
      %cst_20 = arith.constant 1.250000e-01 : f32
      %36 = vector.broadcast %cst_20 : f32 to vector<1x128xf32>
      %37 = arith.mulf %31, %36 : vector<1x128xf32>
      %cst_21 = arith.constant 1.250000e-01 : f32
      %38 = vector.broadcast %cst_21 : f32 to vector<1x128xf32>
      %39 = arith.mulf %35, %38 : vector<1x128xf32>
      %40 = arith.mulf %37, %37 : vector<1x128xf32>
      %41 = arith.subf %39, %40 : vector<1x128xf32>
      %cst_22 = arith.constant 0.000000e+00 : f32
      %42 = vector.broadcast %cst_22 : f32 to vector<1x128xf32>
      %43 = arith.maximumf %41, %42 : vector<1x128xf32>
      %c0_23 = arith.constant 0 : index
      %c0_24 = arith.constant 0 : index
      %44 = vector.load %arg7[%c0_23, %c0_24] : memref<1x128xf32, #tpu.memory_space<vmem>>, vector<1x128xf32>
      %cst_25 = arith.constant 9.99999974E-6 : f32
      %45 = vector.broadcast %cst_25 : f32 to vector<1x128xf32>
      %46 = arith.addf %43, %45 : vector<1x128xf32>
      %47 = math.rsqrt %46 : vector<1x128xf32>
      %48 = arith.mulf %44, %47 : vector<1x128xf32>
      %c0_26 = arith.constant 0 : index
      %c0_27 = arith.constant 0 : index
      %49 = vector.load %arg10[%c0_26, %c0_27] : memref<2x128xf32, #tpu.memory_space<vmem>>, vector<1x128xf32>
      tpu.vector_store %arg10[%c0_26, %c0_27], %48 {strides = array<i32>} : memref<2x128xf32, #tpu.memory_space<vmem>>, vector<1x128xf32>,
      %c0_28 = arith.constant 0 : index
      %c0_29 = arith.constant 0 : index
      %50 = vector.load %arg8[%c0_28, %c0_29] : memref<1x128xf32, #tpu.memory_space<vmem>>, vector<1x128xf32>
      %51 = arith.mulf %37, %48 : vector<1x128xf32>
      %52 = arith.subf %50, %51 : vector<1x128xf32>
      %c1_30 = arith.constant 1 : index
      %c0_31 = arith.constant 0 : index
      %53 = vector.load %arg10[%c1_30, %c0_31] : memref<2x128xf32, #tpu.memory_space<vmem>>, vector<1x128xf32>
      tpu.vector_store %arg10[%c1_30, %c0_31], %52 {strides = array<i32>} : memref<2x128xf32, #tpu.memory_space<vmem>>, vector<1x128xf32>,
    } else {
    }
    return
  }
  func.func @transform_0(%arg0: i32, %arg1: i32) -> (i32, i32) {
    %c0_i32 = arith.constant 0 : i32
    %c0_i32_0 = arith.constant 0 : i32
    return %arg1, %c0_i32 : i32, i32
  }
  func.func @transform_1(%arg0: i32, %arg1: i32) -> (i32, i32) {
    %c0_i32 = arith.constant 0 : i32
    %c0_i32_0 = arith.constant 0 : i32
    %c0_i32_1 = arith.constant 0 : i32
    return %c0_i32, %c0_i32_0 : i32, i32
  }
  func.func @transform_2(%arg0: i32, %arg1: i32) -> (i32, i32) {
    %c0_i32 = arith.constant 0 : i32
    %c0_i32_0 = arith.constant 0 : i32
    %c0_i32_1 = arith.constant 0 : i32
    return %c0_i32, %c0_i32_0 : i32, i32
  }
  func.func @transform_3(%arg0: i32, %arg1: i32) -> (i32, i32) {
    %c0_i32 = arith.constant 0 : i32
    %c0_i32_0 = arith.constant 0 : i32
    %c0_i32_1 = arith.constant 0 : i32
    return %c0_i32, %c0_i32_0 : i32, i32
  }
  func.func @transform_4(%arg0: i32, %arg1: i32) -> (i32, i32) {
    %c0_i32 = arith.constant 0 : i32
    %c0_i32_0 = arith.constant 0 : i32
    %c0_i32_1 = arith.constant 0 : i32
    return %c0_i32, %c0_i32_0 : i32, i32
  }
  func.func @transform_5(%arg0: i32, %arg1: i32) -> (i32, i32) {
    %c0_i32 = arith.constant 0 : i32
    %c0_i32_0 = arith.constant 0 : i32
    %c0_i32_1 = arith.constant 0 : i32
    return %c0_i32, %c0_i32_0 : i32, i32
  }
  func.func @transform_6(%arg0: i32, %arg1: i32) -> (i32, i32) {
    %c0_i32 = arith.constant 0 : i32
    %c0_i32_0 = arith.constant 0 : i32
    %c0_i32_1 = arith.constant 0 : i32
    return %c0_i32, %c0_i32_0 : i32, i32
  }
  func.func @transform_7(%arg0: i32, %arg1: i32) -> (i32, i32) {
    %0 = arith.muli %arg1, %arg0 : i32
    %c0_i32 = arith.constant 0 : i32
    %c0_i32_0 = arith.constant 0 : i32
    return %0, %c0_i32 : i32, i32
  }
  func.func @transform_8(%arg0: i32, %arg1: i32) -> (i32, i32) {
    %c0_i32 = arith.constant 0 : i32
    %c0_i32_0 = arith.constant 0 : i32
    %c0_i32_1 = arith.constant 0 : i32
    return %c0_i32, %c0_i32_0 : i32, i32
  }
}

</mosaic_0001>

<bundles_post_ra>
// kernel: pipeline.3
= control target key start
LH: loop header
LB: loop body
LE: loop exit
PB: predicated region body
PF: predicated region fallthrough
CT: control target
= control target key end

     0   :  { %7 = vsyncpa [#allocation3], 0  ;;  %s192_s0 = inlined_call_operand.hbm [shape: f32[16,128], index: 0, kind: input, shape index: {}, may-alias: {0,2}]   ;;  %s193_s1 = inlined_call_operand.vmem [shape: f32[2,128], index: 1, kind: input, shape index: {}]   ;;  %s194_s2 = inlined_call_operand.hbm [shape: f32[16,128], index: 2, kind: output, shape index: {}, may-alias: {0,2}]  }
   0x1   :  { %8 = vsyncpa [#allocation4], 0  ;;  %s137_s9 = smov [#allocation2]   ;;  %s89_s13 = scalar_lea.hbm %s192_s0, 256 }
   0x2   :  { %s14_s10 = sshll.u32 %s137_s9, 4  ;;  %p90_p0 = scmp.ne.s32.totalorder %s192_s0, %s89_s13  ;;  %s15_s10 = int_to_ptr.vmem [resolvable:$true] %s14_s10 }
   0x3   :  { %p93_p1 = scmp.lt.u32.totalorder %s89_s13, %s192_s0 }
   0x5   :  { %p95_p2 = pnand %p93_p1, %p90_p0 }
   0x7   :  { %98 = shalt.err (!%p95_p2)
}
   0x8   :  { %s99_s18 = scalar_lea.vmem %s15_s10, 256  ;;  %p104_p4 = scmp.lt.s32.totalorder %s15_s10, %s15_s10 }
   0x9   :  { %p100_p3 = scmp.ne.s32.totalorder %s15_s10, %s99_s18  ;;  %p105_p5 = scmp.lt.s32.totalorder %s99_s18, %s99_s18 }
   0xb   :  { %p106_p6 = por %p105_p5, %p104_p4 }
   0xd   :  { %p107_p7 = pnand %p106_p6, %p100_p3 }
   0xf   :  { %110 = shalt.err (!%p107_p7)
}
  0x10   :  { %s138_s19 = smov 128   ;;  %s139_s20 = smov 8  }
  0x11   :  { %20 = dma.hbm_to_vmem [thread:$0]  %s192_s0, 256, %s15_s10, [#allocation3], %s138_s19, %s138_s19, %s139_s20  }
  0x12   :  { %133 = dma.done.wait [#allocation3], 256  }
  0x13   :  { %134 = vsyncadd [#allocation3], 4294967040  ;;  %v26_v0 = vld [vmem:[#allocation2] sm:$0xff]  ;;  %v27_v4 = vld [vmem:[#allocation2 + $0x8] sm:$0xff]  ;;  %s140_s0 = smov [#allocation5]  }
  0x14   :  { %v73_v1 = vld [vmem:[%s193_s1] ss:$0 sm:$0xff]  ;;  %v74_v2 = vld [vmem:[%s193_s1 + $0x1] ss:$0 sm:$0xff]  ;;  %s61_s27 = sshll.u32 %s140_s0, 4  ;;  %s62_s27 = int_to_ptr.vmem [resolvable:$true] %s61_s27 }
  0x15   :  { %v33_v3 = vmul.f32 %v73_v1, %v26_v0  ;;  %v34_v5 = vmul.f32 %v73_v1, %v27_v4  ;;  %s111_s1 = scalar_lea.vmem %s62_s27, 256  ;;  %p116_p9 = scmp.lt.s32.totalorder %s62_s27, %s62_s27 }
  0x16   :  { %p112_p8 = scmp.ne.s32.totalorder %s62_s27, %s111_s1  ;;  %p117_p10 = scmp.lt.s32.totalorder %s111_s1, %s111_s1 }
  0x17   :  { %v40_v6 = vadd.f32 %v74_v2, %v33_v3  ;;  %v41_v7 = vadd.f32 %v74_v2, %v34_v5 }
  0x18   :  { %p118_p11 = por %p117_p10, %p116_p9 }
  0x19   :  { %v75_v8 = vmul.f32 -1.442695, %v40_v6  ;;  %v76_v9 = vmul.f32 -1.442695, %v41_v7 }
  0x1a   :  { %p119_p12 = pnand %p118_p11, %p112_p8 }
  0x1b   :  { %81 = vpow2.f32 %v75_v8 }
  0x1c   :  { %83 = vpow2.f32 %v76_v9 }
  0x25   :  { %v82_v10 = vpop.eup %81 }
  0x26   :  { %v84_v11 = vpop.eup %83  ;;  %v48_v12 = vadd.f32 1.0, %v82_v10 }
  0x27   :  { %v49_v13 = vadd.f32 1.0, %v84_v11 }
  0x28   :  { %85 = vrcp.f32 %v48_v12 }
  0x29   :  { %87 = vrcp.f32 %v49_v13 }
  0x32   :  { %v86_v14 = vpop.eup %85 }
  0x33   :  { %v88_v15 = vpop.eup %87  ;;  %54 = vst [vmem:[#allocation5] sm:$0xff] %v86_v14 }
  0x34   :  { %55 = vst [vmem:[#allocation5 + $0x8] sm:$0xff] %v88_v15 }
  0x35   :  { %122 = shalt.err (!%p119_p12)
}
  0x36   :  { %s123_s30 = scalar_lea.hbm %s194_s2, 256 }
  0x37   :  { %p124_p13 = scmp.ne.s32.totalorder %s194_s2, %s123_s30  ;;  %p127_p0 = scmp.lt.u32.totalorder %s123_s30, %s194_s2 }
  0x39   :  { %p129_p1 = pnand %p127_p0, %p124_p13 }
  0x3b   :  { %132 = shalt.err (!%p129_p1)
}
  0x3c   :  { %67 = dma.vmem_to_hbm [thread:$0]  %s62_s27, 256, %s194_s2, [#allocation4], %s138_s19, %s138_s19, %s139_s20  }
  0x3d   :  { %135 = dma.done.wait [#allocation4], 256  }
  0x3e   :  { %136 = vsyncadd [#allocation4], 4294967040 }
  0x3f   :  { %71 = vsyncpa [#allocation3], 1 }
  0x40   :  { %72 = vsyncpa [#allocation4], 1 }

// kernel: pipeline.2
= control target key start
LH: loop header
LB: loop body
LE: loop exit
PB: predicated region body
PF: predicated region fallthrough
CT: control target
= control target key end

     0   :  { %14 = vsyncpa [#allocation5], 0  ;;  %s1704_s0 = inlined_call_operand.hbm [shape: bf16[16,128], index: 0, kind: input, shape index: {}]   ;;  %s1705_s1 = inlined_call_operand.hbm [shape: bf16[128,128], index: 1, kind: input, shape index: {}]   ;;  %s1706_s2 = inlined_call_operand.vmem [shape: f32[1,128], index: 2, kind: input, shape index: {}]   ;;  %s1707_s3 = inlined_call_operand.vmem [shape: f32[1,128], index: 3, kind: input, shape index: {}]   ;;  %s1708_s4 = inlined_call_operand.hbm [shape: bf16[128,128], index: 4, kind: input, shape index: {}]   ;;  %s1709_s5 = inlined_call_operand.vmem [shape: f32[1,128], index: 5, kind: input, shape index: {}]   ;;  %s1710_s6 = inlined_call_operand.vmem [shape: f32[1,128], index: 6, kind: input, shape index: {}]   ;;  %s1711_s7 = inlined_call_operand.hbm [shape: f32[16,128], index: 7, kind: output, shape index: {0}]   ;;  %s1712_s8 = inlined_call_operand.vmem [shape: f32[2,128], index: 8, kind: output, shape index: {1}]  }
   0x1   :  { %15 = vsyncpa [#allocation8], 0 }
   0x2   :  { %16 = vsyncpa [#allocation6], 0 }
   0x3   :  { %18 = vsyncpa [#allocation6 + $0x1], 0  ;;  %s1517_s27 = smov 0   ;;  %s1519_s28 = smov 0  }
   0x4   :  { %s1521_s29 = smov 0  }
   0x5 LB: > { %1718 = sst [smem:[#allocation14_spill]] %s1451_s28  ;;  %s1716_s30 = sadd.s32 4294967295, %s1455_s29   ;;  %s1455_s29 = sphi %s1521_s29, %s24_s29   ;;  %s1451_s28 = sphi %s1519_s28, %s1731_s28   ;;  %s1447_s27 = sphi %s1517_s27, %s1730_s27  }
   0x6   : > { %p1025_p0 = scmp.ge.s32.totalorder %s1455_s29, 1  ;;  %p242_p1 = scmp.lt.s32.totalorder %s1455_s29, 3 }
   0x7   : > { %p1538_p2 = scmp.eq.s32.totalorder %s1716_s30, 0  ;;  %s1457_s12 = smov [#allocation7]  }
   0x8   : > { %p1542_p3 = pnand %p1025_p0, %p242_p1  ;;  %s270_s13 = sshll.u32 %s1457_s12, 4  ;;  %s271_s13 = int_to_ptr.vmem [resolvable:$true] %s270_s13 }
   0x9   : > { %s1719_s10 = scalar_select %p1538_p2, 1, 0 }
   0xa   : > { %s1720_s11 = scalar_select %p1542_p3, 1, 0 }
   0xb   : > { %p1211_p4 = pneg %p1542_p3  ;;  %s36_s15 = sadd.s32 1, %s1451_s28 }
   0xc   : > { %p1555_p6 = scmp.ge.s32.totalorder %s36_s15, 2  ;;  %s1311_s19 = scalar_lea.hbm %s1705_s1, 1024 }
   0xd   : > { %p1550_p5 = pnand %p1538_p2, %p1211_p4  ;;  %p1312_p7 = scmp.ne.s32.totalorder %s1705_s1, %s1311_s19 }
   0xe   : > { %s1722_s16 = scalar_select %p1555_p6, 1, 0 }
   0xf   : > { %p1567_p8 = pneg %p1550_p5  ;;  %p1318_p11 = scmp.lt.u32.totalorder %s1311_s19, %s1705_s1 }
  0x11   : > { %p1314_p9 = pnand %p1567_p8, %p1312_p7 }
  0x13   : > { %p1315_p10 = pneg %p1314_p9 }
  0x15   : > { %p1320_p12 = pnand %p1318_p11, %p1315_p10 }
  0x17   : > { %1323 = shalt.err (!%p1320_p12)
}
  0x18   : > { %s1324_s25 = scalar_lea.vmem %s271_s13, 1024  ;;  %p1332_p4 = scmp.lt.s32.totalorder %s271_s13, %s271_s13 }
  0x19   : > { %p1325_p13 = scmp.ne.s32.totalorder %s271_s13, %s1324_s25  ;;  %p1333_p2 = scmp.lt.s32.totalorder %s1324_s25, %s1324_s25 }
  0x1b   : > { %p1327_p0 = pnand %p1325_p13, %p1567_p8  ;;  %p1334_p3 = por %p1333_p2, %p1332_p4 }
  0x1d   : > { %p1328_p1 = pneg %p1327_p0 }
  0x1f   : > { %p1335_p6 = pnand %p1334_p3, %p1328_p1 }
  0x21   : > { %1338 = shalt.err (!%p1335_p6)
}
  0x22   : > { %s1458_s26 = smov 64   ;;  %s1459_s12 = smov 4  }
  0x23   : > { %1217 = dma.hbm_to_vmem [thread:$0]  (!%p1550_p5), %s1705_s1, 1024, %s271_s13, [#allocation8], %s1458_s26, %s1458_s26, %s1459_s12  }
  0x24   : > { %p1724_p7 = scmp.ne.s32.totalorder %s1722_s16, 0  ;;  %s1460_s19 = smov [#allocation4]  }
  0x25   : > { %s257_s20 = sshll.u32 %s1460_s19, 4  ;;  %s1461_s21 = smov [#allocation9]   ;;  %s258_s20 = int_to_ptr.vmem [resolvable:$true] %s257_s20 }
  0x26   : > { %s1733_s15 = smov (%p1724_p7, %s36_s15), 0  ;;  %s289_s23 = sshll.u32 %s1461_s21, 4  ;;  %s290_s23 = int_to_ptr.vmem [resolvable:$true] %s289_s23 }
  0x27   : > { %s1339_s9 = scalar_lea.hbm %s1704_s0, 128 }
  0x28   : > { %p1340_p2 = scmp.ne.s32.totalorder %s1704_s0, %s1339_s9  ;;  %p1346_p9 = scmp.lt.u32.totalorder %s1339_s9, %s1704_s0 }
  0x2a   : > { %p1342_p3 = pnand %p1340_p2, %p1567_p8 }
  0x2c   : > { %p1343_p6 = pneg %p1342_p3 }
  0x2e   : > { %p1348_p10 = pnand %p1346_p9, %p1343_p6 }
  0x30   : > { %1351 = shalt.err (!%p1348_p10)
}
  0x31   : > { %s1352_s17 = scalar_lea.vmem %s258_s20, 128  ;;  %p1360_p0 = scmp.lt.s32.totalorder %s258_s20, %s258_s20 }
  0x32   : > { %p1353_p11 = scmp.ne.s32.totalorder %s258_s20, %s1352_s17  ;;  %p1361_p1 = scmp.lt.s32.totalorder %s1352_s17, %s1352_s17 }
  0x34   : > { %p1355_p12 = pnand %p1353_p11, %p1567_p8  ;;  %p1362_p4 = por %p1361_p1, %p1360_p0 }
  0x36   : > { %p1356_p13 = pneg %p1355_p12 }
  0x38   : > { %p1363_p7 = pnand %p1362_p4, %p1356_p13 }
  0x3a   : > { %1366 = shalt.err (!%p1363_p7)
}
  0x3b   : > { %1214 = dma.hbm_to_vmem [thread:$0]  (!%p1550_p5), %s1704_s0, 128, %s258_s20, [#allocation5], %s1458_s26, %s1458_s26, %s1459_s12  }
  0x3c   : > { %s1367_s19 = scalar_lea.hbm %s1708_s4, 1024 }
  0x3d   : > { %p1368_p2 = scmp.ne.s32.totalorder %s1708_s4, %s1367_s19  ;;  %p1374_p9 = scmp.lt.u32.totalorder %s1367_s19, %s1708_s4 }
  0x3f   : > { %p1370_p3 = pnand %p1368_p2, %p1567_p8 }
  0x41   : > { %p1371_p6 = pneg %p1370_p3 }
  0x43   : > { %p1376_p10 = pnand %p1374_p9, %p1371_p6 }
  0x45   : > { %1379 = shalt.err (!%p1376_p10)
}
  0x46   : > { %s1380_s16 = scalar_lea.vmem %s290_s23, 1024  ;;  %p1388_p0 = scmp.lt.s32.totalorder %s290_s23, %s290_s23 }
  0x47   : > { %p1381_p11 = scmp.ne.s32.totalorder %s290_s23, %s1380_s16  ;;  %p1389_p1 = scmp.lt.s32.totalorder %s1380_s16, %s1380_s16 }
  0x49   : > { %p1383_p12 = pnand %p1381_p11, %p1567_p8  ;;  %p1390_p4 = por %p1389_p1, %p1388_p0 }
  0x4b   : > { %p1384_p13 = pneg %p1383_p12 }
  0x4d   : > { %p1391_p7 = pnand %p1390_p4, %p1384_p13 }
  0x4f   : > { %1394 = shalt.err (!%p1391_p7)
}
  0x50   : > { %1220 = dma.hbm_to_vmem [thread:$0]  (!%p1550_p5), %s1708_s4, 1024, %s290_s23, [#allocation8], %s1458_s26, %s1458_s26, %s1459_s12  }
  0x51   : > { %p1725_p2 = scmp.ne.s32.totalorder %s1720_s11, 0 }
  0x52   : > { %p1726_p8 = scmp.ne.s32.totalorder (!%p1725_p2), %s1719_s10, 0 }
  0x53   : > { %311 = sbr.rel (%p1725_p2) target bundleno = 1192 (0x4a8), region = 48 }
  0x5a   : > { %1434 = dma.done.wait (%p1726_p8), [#allocation5], 128  }
  0x5b   : > { %1436 = vsyncadd (%p1726_p8), [#allocation5], 4294967168 }
  0x5c   : > { %1438 = dma.done.wait (%p1726_p8), [#allocation8], 2048  }
  0x5d   : > { %1440 = vsyncadd (%p1726_p8), [#allocation8], 4294965248  ;;  %p352_p3 = scmp.eq.s32.totalorder %s1447_s27, 0 }
  0x5e   : > { %v1462_v0 = vmov (%p352_p3), 0.0  }
  0x5f   : > { %357 = sbr.rel (!%p352_p3) target bundleno = 102 (0x66), region = 64  ;;  %358 = vst [vmem:[#allocation2] sm:$0x3] (%p352_p3), %v1462_v0  ;;  %359 = vst [vmem:[#allocation3] sm:$0x3] (%p352_p3), %v1462_v0 }
  0x66 PF: > { %p1034_p5 = scmp.ne.s32.totalorder %s1447_s27, 0 }
  0x67   : > { %v1273_v1 = vld [vmem:[#allocation7] sm:$0xff] (!%p1034_p5)   ;;  %v1463_v2 = vmov (!%p1034_p5), 0.0   ;;  %v1274_v3 = vld [vmem:[#allocation7 + $0x8] sm:$0xff] (!%p1034_p5)   ;;  %vm1464_vm0 = vmmov (!%p1034_p5), 0   ;;  %v1275_v4 = vld [vmem:[#allocation7 + $0x10] sm:$0xff] (!%p1034_p5)  }
  0x68   : > { %362 = sbr.rel (%p1034_p5) target bundleno = 369 (0x171), region = 68  ;;  %1115 = vmatprep.subr.bf16.mxu0 (!%p1034_p5), %v1463_v2  ;;  %1131 = vmatprep.mubr.msk.bf16.mxu0 (!%p1034_p5), %vm1464_vm0, %v1463_v2  ;;  %v1276_v5 = vld [vmem:[#allocation7 + $0x18] sm:$0xff] (!%p1034_p5)   ;;  %v1277_v6 = vld [vmem:[#allocation7 + $0x20] sm:$0xff] (!%p1034_p5)   ;;  %v1278_v7 = vld [vmem:[#allocation7 + $0x28] sm:$0xff] (!%p1034_p5)  }
  0x69   : > { %1116 = vmatpush3.bf16.msra.mxu0 (!%p1034_p5), %v1273_v1  ;;  %v1279_v8 = vld [vmem:[#allocation7 + $0x30] sm:$0xff] (!%p1034_p5)   ;;  %v1280_v9 = vld [vmem:[#allocation7 + $0x38] sm:$0xff] (!%p1034_p5)  }
  0x6a   : > { %1117 = vmatprep.subr.bf16.mxu0 (!%p1034_p5), %v1463_v2  ;;  %v1281_v10 = vld [vmem:[#allocation4] sm:$0xff] (!%p1034_p5)   ;;  %v476_v28 = vld [vmem:[#allocation2] sm:$0x1] (!%p1034_p5)  ;;  %v486_v31 = vld [vmem:[#allocation2 + $0x1] sm:$0x1] (!%p1034_p5) }
  0x6d   : > { %1118 = vmatpush3.bf16.msra.mxu0 (!%p1034_p5), %v1274_v3 }
  0x6e   : > { %1119 = vmatprep.subr.bf16.mxu0 (!%p1034_p5), %v1463_v2 }
  0x71   : > { %1120 = vmatpush3.bf16.msra.mxu0 %v1275_v4 }
  0x72   : > { %1121 = vmatprep.subr.bf16.mxu0 %v1463_v2 }
  0x75   : > { %1122 = vmatpush3.bf16.msra.mxu0 %v1276_v5 }
  0x76   : > { %1123 = vmatprep.subr.bf16.mxu0 %v1463_v2 }
  0x79   : > { %1124 = vmatpush3.bf16.msra.mxu0 %v1277_v6 }
  0x7a   : > { %1125 = vmatprep.subr.bf16.mxu0 %v1463_v2 }
  0x7d   : > { %1126 = vmatpush3.bf16.msra.mxu0 %v1278_v7 }
  0x7e   : > { %1127 = vmatprep.subr.bf16.mxu0 %v1463_v2 }
  0x81   : > { %1128 = vmatpush3.bf16.msra.mxu0 %v1279_v8 }
  0x82   : > { %1129 = vmatprep.subr.bf16.mxu0 %v1463_v2 }
  0x85   : > { %1130 = vmatpush3.bf16.msra.mxu0 %v1280_v9 }
  0x88   : > { %1132 = vmatmul.mubr.bf16.vlgmr.msra.gmra.mrb[0].mxu0 %v1281_v10 }
 0x15b   : > { %v469_v11 = vpop.f32.mrb[0].mxu0 }
 0x15c   : > { %v1133_v12 = vpop.f32.mrb[1].mxu0  ;;  %v487_v14 = vmul.f32 %v469_v11, %v469_v11 }
 0x15d   : > { %v472_v13 = vpop.f32.mrb[2].mxu0 }
 0x15e   : > { %v477_v15 = vadd.f32 %v472_v13, %v469_v11  ;;  %v488_v16 = vmul.f32 %v472_v13, %v472_v13  ;;  %v1134_v17 = vpop.f32.mrb[3].mxu0 }
 0x160   : > { %v478_v18 = vrot.slane %v477_v15, 4  ;;  %v489_v19 = vadd.f32 %v488_v16, %v487_v14 }
 0x162   : > { %v479_v20 = vadd.f32 %v478_v18, %v477_v15  ;;  %v490_v21 = vrot.slane %v489_v19, 4 }
 0x164   : > { %v480_v22 = vrot.slane %v479_v20, 2  ;;  %v491_v23 = vadd.f32 %v490_v21, %v489_v19 }
 0x166   : > { %v481_v24 = vadd.f32 %v480_v22, %v479_v20  ;;  %v492_v25 = vrot.slane %v491_v23, 2 }
 0x168   : > { %v482_v26 = vrot.slane %v481_v24, 1  ;;  %v493_v27 = vadd.f32 %v492_v25, %v491_v23 }
 0x16a   : > { %v483_v29 = vadd.f32 %v482_v26, %v481_v24  ;;  %v494_v30 = vrot.slane %v493_v27, 1 }
 0x16c   : > { %v484_v32 = vadd.f32 %v483_v29, %v476_v28  ;;  %v495_v33 = vadd.f32 %v494_v30, %v493_v27 }
 0x16e   : > { %485 = vst [vmem:[#allocation2] sm:$0x1] %v484_v32  ;;  %v496_v34 = vadd.f32 %v495_v33, %v486_v31 }
 0x170   : > { %497 = vst [vmem:[#allocation2 + $0x1] sm:$0x1] %v496_v34 }
 0x171 PF: > { %p498_p6 = scmp.eq.s32.totalorder %s1447_s27, 1 }
 0x172   : > { %v510_v43 = vld [vmem:[%s1706_s2] sm:$0x1] (%p498_p6) }
 0x173   : > { %502 = sbr.rel (!%p498_p6) target bundleno = 402 (0x192), region = 72  ;;  %v515_v46 = vld [vmem:[%s1707_s3] sm:$0x1] (%p498_p6) }
 0x175   : > { %v503_v35 = vld [vmem:[#allocation2] sm:$0x1] (%p498_p6) }
 0x176   : > { %v505_v37 = vmul.f32 (%p498_p6), 0.125, %v503_v35 }
 0x177   : > { %v504_v36 = vld [vmem:[#allocation2 + $0x1] sm:$0x1] (%p498_p6) }
 0x178   : > { %v506_v38 = vmul.f32 (%p498_p6), 0.125, %v504_v36  ;;  %v507_v39 = vmul.f32 (%p498_p6), %v505_v37, %v505_v37 }
 0x17a   : > { %v508_v40 = vsub.f32 %v506_v38, %v507_v39 }
 0x17c   : > { %v509_v41 = vmax.f32 %v508_v40, 0.0 }
 0x17e   : > { %v511_v42 = vadd.f32 1e-05, %v509_v41 }
 0x180   : > { %1282 = vrsqrt.f32 %v511_v42 }
 0x18a   : > { %v1283_v44 = vpop.eup %1282 }
 0x18b   : > { %v513_v45 = vmul.f32 %v1283_v44, %v510_v43 }
 0x18d   : > { %514 = vst [vmem:[#allocation2] sm:$0x1] %v513_v45  ;;  %v516_v47 = vmul.f32 %v513_v45, %v505_v37 }
 0x18f   : > { %v517_v48 = vsub.f32 %v515_v46, %v516_v47 }
 0x191   : > { %518 = vst [vmem:[#allocation2 + $0x1] sm:$0x1] %v517_v48 }
 0x192 PF: > { %p1045_p9 = scmp.ne.s32.totalorder %s1447_s27, 1 }
 0x193   : > { %v1284_v49 = vld [vmem:[#allocation7] sm:$0xff] (!%p1045_p9)   ;;  %v1465_v50 = vmov (!%p1045_p9), 0.0   ;;  %v1285_v51 = vld [vmem:[#allocation7 + $0x8] sm:$0xff] (!%p1045_p9)   ;;  %vm1466_vm1 = vmmov (!%p1045_p9), 0   ;;  %v1286_v52 = vld [vmem:[#allocation7 + $0x10] sm:$0xff] (!%p1045_p9)  }
 0x194   : > { %521 = sbr.rel (%p1045_p9) target bundleno = 891 (0x37b), region = 76  ;;  %1135 = vmatprep.subr.bf16.mxu0 (!%p1045_p9), %v1465_v50  ;;  %1155 = vmatprep.subr.bf16.mxu1 (!%p1045_p9), %v1465_v50  ;;  %v1293_v53 = vld [vmem:[#allocation9] sm:$0xff] (!%p1045_p9)   ;;  %v1287_v54 = vld [vmem:[#allocation7 + $0x18] sm:$0xff] (!%p1045_p9)   ;;  %v1294_v55 = vld [vmem:[#allocation9 + $0x8] sm:$0xff] (!%p1045_p9)  }
 0x195   : > { %1136 = vmatpush3.bf16.msra.mxu0 (!%p1045_p9), %v1284_v49  ;;  %1151 = vmatprep.mubr.msk.bf16.mxu0 (!%p1045_p9), %vm1466_vm1, %v1465_v50  ;;  %v1288_v56 = vld [vmem:[#allocation7 + $0x20] sm:$0xff] (!%p1045_p9)   ;;  %v1295_v57 = vld [vmem:[#allocation9 + $0x10] sm:$0xff] (!%p1045_p9)   ;;  %v1289_v58 = vld [vmem:[#allocation7 + $0x28] sm:$0xff] (!%p1045_p9)  }
 0x196   : > { %1137 = vmatprep.subr.bf16.mxu0 (!%p1045_p9), %v1465_v50  ;;  %1171 = vmatprep.mubr.msk.bf16.mxu1 (!%p1045_p9), %vm1466_vm1, %v1465_v50  ;;  %v1296_v59 = vld [vmem:[#allocation9 + $0x18] sm:$0xff] (!%p1045_p9)   ;;  %v1290_v60 = vld [vmem:[#allocation7 + $0x30] sm:$0xff] (!%p1045_p9)   ;;  %v1297_v61 = vld [vmem:[#allocation9 + $0x20] sm:$0xff] (!%p1045_p9)  }
 0x197   : > { %1156 = vmatpush3.bf16.msra.mxu1 (!%p1045_p9), %v1293_v53  ;;  %v1291_v62 = vld [vmem:[#allocation7 + $0x38] sm:$0xff] (!%p1045_p9)   ;;  %v1298_v0 = vld [vmem:[#allocation9 + $0x28] sm:$0xff] (!%p1045_p9)   ;;  %v1299_v1 = vld [vmem:[#allocation9 + $0x30] sm:$0xff] (!%p1045_p9)  }
 0x198   : > { %1157 = vmatprep.subr.bf16.mxu1 (!%p1045_p9), %v1465_v50  ;;  %v1292_v63 = vld [vmem:[#allocation4] sm:$0xff] (!%p1045_p9)   ;;  %v1055_v3 = vld [vmem:[#allocation2] ss:$0 sm:$0xff] (!%p1045_p9)  ;;  %v1056_v5 = vld [vmem:[#allocation2 + $0x1] ss:$0 sm:$0xff] (!%p1045_p9) }
 0x199   : > { %1138 = vmatpush3.bf16.msra.mxu0 (!%p1045_p9), %v1285_v51  ;;  %v1300_v2 = vld [vmem:[#allocation9 + $0x38] sm:$0xff] (!%p1045_p9)   ;;  %v759_v33 = vld [vmem:[#allocation3] sm:$0x1] (!%p1045_p9)  ;;  %v769_v36 = vld [vmem:[#allocation3 + $0x1] sm:$0x1] (!%p1045_p9) }
 0x19a   : > { %1139 = vmatprep.subr.bf16.mxu0 (!%p1045_p9), %v1465_v50 }
 0x19b   : > { %1158 = vmatpush3.bf16.msra.mxu1 %v1294_v55 }
 0x19c   : > { %1159 = vmatprep.subr.bf16.mxu1 %v1465_v50 }
 0x19d   : > { %1140 = vmatpush3.bf16.msra.mxu0 %v1286_v52 }
 0x19e   : > { %1141 = vmatprep.subr.bf16.mxu0 %v1465_v50 }
 0x19f   : > { %1160 = vmatpush3.bf16.msra.mxu1 %v1295_v57 }
 0x1a0   : > { %1161 = vmatprep.subr.bf16.mxu1 %v1465_v50 }
 0x1a1   : > { %1142 = vmatpush3.bf16.msra.mxu0 %v1287_v54 }
 0x1a2   : > { %1143 = vmatprep.subr.bf16.mxu0 %v1465_v50 }
 0x1a3   : > { %1162 = vmatpush3.bf16.msra.mxu1 %v1296_v59 }
 0x1a4   : > { %1163 = vmatprep.subr.bf16.mxu1 %v1465_v50 }
 0x1a5   : > { %1144 = vmatpush3.bf16.msra.mxu0 %v1288_v56 }
 0x1a6   : > { %1145 = vmatprep.subr.bf16.mxu0 %v1465_v50 }
 0x1a7   : > { %1164 = vmatpush3.bf16.msra.mxu1 %v1297_v61 }
 0x1a8   : > { %1165 = vmatprep.subr.bf16.mxu1 %v1465_v50 }
 0x1a9   : > { %1146 = vmatpush3.bf16.msra.mxu0 %v1289_v58 }
 0x1aa   : > { %1147 = vmatprep.subr.bf16.mxu0 %v1465_v50 }
 0x1ab   : > { %1166 = vmatpush3.bf16.msra.mxu1 %v1298_v0 }
 0x1ac   : > { %1167 = vmatprep.subr.bf16.mxu1 %v1465_v50 }
 0x1ad   : > { %1148 = vmatpush3.bf16.msra.mxu0 %v1290_v60 }
 0x1ae   : > { %1149 = vmatprep.subr.bf16.mxu0 %v1465_v50 }
 0x1af   : > { %1168 = vmatpush3.bf16.msra.mxu1 %v1299_v1 }
 0x1b0   : > { %1169 = vmatprep.subr.bf16.mxu1 %v1465_v50 }
 0x1b1   : > { %1150 = vmatpush3.bf16.msra.mxu0 %v1291_v62 }
 0x1b3   : > { %1170 = vmatpush3.bf16.msra.mxu1 %v1300_v2 }
 0x1b4   : > { %1152 = vmatmul.mubr.bf16.vlgmr.msra.gmra.mrb[0].mxu0 %v1292_v63 }
 0x287   : > { %v628_v4 = vpop.f32.mrb[0].mxu0 }
 0x288   : > { %v640_v6 = vmul.f32 %v1055_v3, %v628_v4  ;;  %v1153_v7 = vpop.f32.mrb[1].mxu0 }
 0x289   : > { %v631_v8 = vpop.f32.mrb[2].mxu0 }
 0x28a   : > { %v647_v9 = vadd.f32 %v1056_v5, %v640_v6  ;;  %v641_v10 = vmul.f32 %v1055_v3, %v631_v8  ;;  %v1154_v11 = vpop.f32.mrb[3].mxu0 }
 0x28c   : > { %v648_v12 = vadd.f32 %v1056_v5, %v641_v10  ;;  %v649_v13 = vmax.f32 %v647_v9, 0.0 }
 0x28e   : > { %v650_v14 = vmax.f32 %v648_v12, 0.0 }
 0x290   : > { %v651_v15 = vpack.c.bf16 %v650_v14, %v649_v13 }
 0x292   : > { %1172 = vmatmul.mubr.bf16.vlgmr.msra.gmra.mrb[0].mxu1 %v651_v15 }
 0x365   : > { %v750_v16 = vpop.f32.mrb[0].mxu1 }
 0x366   : > { %757 = vst [vmem:[#allocation10] sm:$0xff] %v750_v16  ;;  %v1173_v17 = vpop.f32.mrb[1].mxu1  ;;  %v770_v19 = vmul.f32 %v750_v16, %v750_v16 }
 0x367   : > { %v753_v18 = vpop.f32.mrb[2].mxu1 }
 0x368   : > { %758 = vst [vmem:[#allocation10 + $0x8] sm:$0xff] %v753_v18  ;;  %v760_v20 = vadd.f32 %v753_v18, %v750_v16  ;;  %v771_v21 = vmul.f32 %v753_v18, %v753_v18  ;;  %v1174_v22 = vpop.f32.mrb[3].mxu1 }
 0x36a   : > { %v761_v23 = vrot.slane %v760_v20, 4  ;;  %v772_v24 = vadd.f32 %v771_v21, %v770_v19 }
 0x36c   : > { %v762_v25 = vadd.f32 %v761_v23, %v760_v20  ;;  %v773_v26 = vrot.slane %v772_v24, 4 }
 0x36e   : > { %v763_v27 = vrot.slane %v762_v25, 2  ;;  %v774_v28 = vadd.f32 %v773_v26, %v772_v24 }
 0x370   : > { %v764_v29 = vadd.f32 %v763_v27, %v762_v25  ;;  %v775_v30 = vrot.slane %v774_v28, 2 }
 0x372   : > { %v765_v31 = vrot.slane %v764_v29, 1  ;;  %v776_v32 = vadd.f32 %v775_v30, %v774_v28 }
 0x374   : > { %v766_v34 = vadd.f32 %v765_v31, %v764_v29  ;;  %v777_v35 = vrot.slane %v776_v32, 1 }
 0x376   : > { %v767_v37 = vadd.f32 %v766_v34, %v759_v33  ;;  %v778_v38 = vadd.f32 %v777_v35, %v776_v32 }
 0x378   : > { %768 = vst [vmem:[#allocation3] sm:$0x1] %v767_v37  ;;  %v779_v39 = vadd.f32 %v778_v38, %v769_v36 }
 0x37a   : > { %780 = vst [vmem:[#allocation3 + $0x1] sm:$0x1] %v779_v39 }
 0x37b PF: > { %782 = sbr.rel (!%p498_p6) target bundleno = 1168 (0x490), region = 80  ;;  %v1301_v40 = vld [vmem:[#allocation9] sm:$0xff] (%p498_p6)   ;;  %v1467_v41 = vmov (%p498_p6), 0.0   ;;  %v1302_v42 = vld [vmem:[#allocation9 + $0x8] sm:$0xff] (%p498_p6)   ;;  %vm1468_vm2 = vmmov (%p498_p6), 0   ;;  %v1303_v43 = vld [vmem:[#allocation9 + $0x10] sm:$0xff] (%p498_p6)  }
 0x37c   : > { %1175 = vmatprep.subr.bf16.mxu0 (%p498_p6), %v1467_v41  ;;  %1191 = vmatprep.mubr.msk.bf16.mxu0 (%p498_p6), %vm1468_vm2, %v1467_v41  ;;  %v1304_v44 = vld [vmem:[#allocation9 + $0x18] sm:$0xff] (%p498_p6)   ;;  %v1305_v45 = vld [vmem:[#allocation9 + $0x20] sm:$0xff] (%p498_p6)   ;;  %v1306_v46 = vld [vmem:[#allocation9 + $0x28] sm:$0xff] (%p498_p6)  }
 0x37d   : > { %1176 = vmatpush3.bf16.msra.mxu0 (%p498_p6), %v1301_v40  ;;  %v1307_v47 = vld [vmem:[#allocation9 + $0x30] sm:$0xff] (%p498_p6)   ;;  %v1308_v50 = vld [vmem:[#allocation9 + $0x38] sm:$0xff] (%p498_p6)  }
 0x37e   : > { %1177 = vmatprep.subr.bf16.mxu0 (%p498_p6), %v1467_v41  ;;  %v785_v48 = vld [vmem:[#allocation2 + $0x1] sm:$0x1] (%p498_p6)  ;;  %v902_v5 = vld [vmem:[%s1709_s5] sm:$0x1] (%p498_p6) }
 0x37f   : > { %v786_v49 = vmax.f32 (%p498_p6), %v785_v48, 0.0  ;;  %v783_v52 = vld [vmem:[#allocation3] sm:$0x1] (%p498_p6)  ;;  %v907_v8 = vld [vmem:[%s1710_s6] sm:$0x1] (%p498_p6) }
 0x381   : > { %1178 = vmatpush3.bf16.msra.mxu0 (%p498_p6), %v1302_v42  ;;  %v787_v51 = vpack.c.bf16 (%p498_p6), %v786_v49, %v786_v49  ;;  %v784_v57 = vld [vmem:[#allocation3 + $0x1] sm:$0x1] (%p498_p6) }
 0x382   : > { %1179 = vmatprep.subr.bf16.mxu0 %v1467_v41 }
 0x385   : > { %1180 = vmatpush3.bf16.msra.mxu0 %v1303_v43 }
 0x386   : > { %1181 = vmatprep.subr.bf16.mxu0 %v1467_v41 }
 0x389   : > { %1182 = vmatpush3.bf16.msra.mxu0 %v1304_v44 }
 0x38a   : > { %1183 = vmatprep.subr.bf16.mxu0 %v1467_v41 }
 0x38d   : > { %1184 = vmatpush3.bf16.msra.mxu0 %v1305_v45 }
 0x38e   : > { %1185 = vmatprep.subr.bf16.mxu0 %v1467_v41 }
 0x391   : > { %1186 = vmatpush3.bf16.msra.mxu0 %v1306_v46 }
 0x392   : > { %1187 = vmatprep.subr.bf16.mxu0 %v1467_v41 }
 0x395   : > { %1188 = vmatpush3.bf16.msra.mxu0 %v1307_v47 }
 0x396   : > { %1189 = vmatprep.subr.bf16.mxu0 %v1467_v41 }
 0x399   : > { %1190 = vmatpush3.bf16.msra.mxu0 %v1308_v50 }
 0x39c   : > { %1192 = vmatmul.mubr.bf16.vlgmr.msra.gmra.mrb[0].mxu0 %v787_v51 }
 0x46f   : > { %v886_v53 = vpop.f32.mrb[0].mxu0 }
 0x470   : > { %v892_v54 = vmul.f32 8.0, %v886_v53  ;;  %v894_v55 = vmul.f32 %v886_v53, %v886_v53  ;;  %v1193_v56 = vpop.f32.mrb[1].mxu0 }
 0x471   : > { %v889_v58 = vpop.f32.mrb[2].mxu0 }
 0x472   : > { %v893_v59 = vsub.f32 %v783_v52, %v892_v54  ;;  %v895_v60 = vmul.f32 8.0, %v894_v55  ;;  %v1194_v61 = vpop.f32.mrb[3].mxu0 }
 0x474   : > { %v896_v62 = vsub.f32 %v784_v57, %v895_v60  ;;  %v897_v63 = vmul.f32 0.125, %v893_v59 }
 0x476   : > { %v898_v0 = vmul.f32 0.125, %v896_v62  ;;  %v899_v1 = vmul.f32 %v897_v63, %v897_v63 }
 0x478   : > { %v900_v2 = vsub.f32 %v898_v0, %v899_v1 }
 0x47a   : > { %v901_v3 = vmax.f32 %v900_v2, 0.0 }
 0x47c   : > { %v903_v4 = vadd.f32 1e-05, %v901_v3 }
 0x47e   : > { %1309 = vrsqrt.f32 %v903_v4 }
 0x488   : > { %v1310_v6 = vpop.eup %1309 }
 0x489   : > { %v905_v7 = vmul.f32 %v1310_v6, %v902_v5 }
 0x48b   : > { %906 = vst [vmem:[%s1712_s8] sm:$0x1] %v905_v7  ;;  %v908_v9 = vmul.f32 %v905_v7, %v897_v63 }
 0x48d   : > { %v909_v10 = vsub.f32 %v907_v8, %v908_v9 }
 0x48f   : > { %910 = vst [vmem:[%s1712_s8 + $0x1] sm:$0x1] %v909_v10 }
 0x490 PF: > { %s1727_s19 = sadd.s32 4294967295, %s1455_s29   ;;  %s1469_s24 = smov [#allocation10]  }
 0x491   : > { %p1670_p10 = scmp.eq.s32.totalorder %s1727_s19, 1  ;;  %s926_s25 = sshll.u32 %s1469_s24, 4  ;;  %s927_s25 = int_to_ptr.vmem [resolvable:$true] %s926_s25 }
 0x492   : > { %s1395_s13 = scalar_lea.vmem %s927_s25, 256  ;;  %s1401_s16 = scalar_lea.vmem %s927_s25, 512 }
 0x493   : > { %p1396_p11 = scmp.ne.s32.totalorder %s927_s25, %s1395_s13  ;;  %p1402_p0 = scmp.lt.s32.totalorder %s927_s25, %s927_s25 }
 0x494   : > { %p1403_p1 = scmp.lt.s32.totalorder %s1401_s16, %s1395_s13 }
 0x495   : > { %p1397_p12 = pnand %p1396_p11, %p1670_p10 }
 0x496   : > { %p1404_p4 = por %p1403_p1, %p1402_p0 }
 0x497   : > { %p1398_p13 = pneg %p1397_p12 }
 0x499   : > { %p1405_p7 = pnand %p1404_p4, %p1398_p13 }
 0x49b   : > { %1408 = shalt.err (!%p1405_p7)
}
 0x49c   : > { %s1409_s10 = scalar_lea.hbm %s1711_s7, 256 }
 0x49d   : > { %p1410_p2 = scmp.ne.s32.totalorder %s1711_s7, %s1409_s10  ;;  %p1415_p5 = scmp.lt.u32.totalorder %s1409_s10, %s1711_s7 }
 0x49f   : > { %p1411_p8 = pnand %p1410_p2, %p1670_p10 }
 0x4a1   : > { %p1412_p3 = pneg %p1411_p8 }
 0x4a3   : > { %p1417_p6 = pnand %p1415_p5, %p1412_p3 }
 0x4a5   : > { %1420 = shalt.err (!%p1417_p6)
}
 0x4a6   : > { %s1470_s26 = smov 128   ;;  %s1471_s12 = smov 8  }
 0x4a7   : > { %1208 = dma.vmem_to_hbm [thread:$0]  (%p1670_p10), %s927_s25, 256, %s1711_s7, [#allocation6], %s1470_s26, %s1470_s26, %s1471_s12  }
 0x4a8 PF: > { %p1232_p9 = scmp.ge.s32.totalorder %s1455_s29, 2  ;;  %s1729_s30 = sadd.s32 4294967294, %s1455_s29  }
 0x4a9   : > { %p1233_p11 = scmp.eq.s32.totalorder %s1729_s30, 1 }
 0x4ab   : > { %p1222_p12 = pnand %p1233_p11, %p1232_p9 }
 0x4ad   : > { %1442 = dma.done.wait (!%p1222_p12), [#allocation6], 256  }
 0x4ae   : > { %1444 = vsyncadd (!%p1222_p12), [#allocation6], 4294967040  ;;  %s24_s29 = sadd.s32 1, %s1455_s29   ;;  %s1730_s27 = sld [smem:[#allocation14_spill]] }
 0x4af   : > { %p21_p13 = scmp.ge.s32.totalorder %s24_s29, 4   ;;  %s1731_s28 = smov %s1733_s15 }
 0x4b1   :  { %23 = sbr.rel (!%p21_p13) target bundleno = 5 (0x5), region = 122 }
 0x4b8   :  { %953 = vsyncpa [#allocation5], 1 }
 0x4b9   :  { %955 = vsyncpa [#allocation5 + $0x1], 1 }
 0x4ba   :  { %956 = vsyncpa [#allocation8], 1 }
 0x4bb   :  { %957 = vsyncpa [#allocation6], 1 }
 0x4bc   :  { %959 = vsyncpa [#allocation6 + $0x1], 1 }

</bundles_post_ra>
